<compile_context>
chip_gen: v7x
topology: tpu7x:2x2x1
jax: 0.10.0
libtpu: 0.0.40
codegen_flags: <defaults>
</compile_context>

<pallas_src>
import jax
import jax.numpy as jnp
from jax import lax
from jax.experimental import pallas as pl
from jax.experimental.pallas import tpu as pltpu

LANES = 128
MAX_TILE_ROWS = 2048   # (2048,128) f32 block = 1 MiB/input; 2 in x 2 bufs = 4 MiB VMEM
MAX_SHARDS = 2         # leading "parallel" axis -> both TCs on v7x; harmless on 1-TC chips


def _make_kernel(rows_valid: int, tile_rows: int, blocks_per_shard: int,
                 need_mask: bool):
    def kernel(pos_ref, neg_ref, out_ref):
        s = pl.program_id(0)   # shard (parallel axis)
        i = pl.program_id(1)   # streaming step within this shard (reduction axis)

        @pl.when(i == 0)
        def _init():
            out_ref[...] = jnp.zeros_like(out_ref)

        # Single fused difference stream; cast is a free in-vreg VPU op.
        d = neg_ref[...].astype(jnp.float32) - pos_ref[...].astype(jnp.float32)

        if need_mask:
            # Zero out rows that fall past the real data (ragged last block or
            # phantom blocks of an uneven shard split).
            b = s * blocks_per_shard + i          # global (unclamped) block id
            row_ids = b * tile_rows + lax.broadcasted_iota(
                jnp.int32, (tile_rows, LANES), 0)
            d = jnp.where(row_ids < rows_valid, d, 0.0)

        if tile_rows % 8 == 0:
            # Fold the (tile_rows,128) tile vreg-wise into the (8,128) partial
            # slab: pure VPU adds, no XLU work in the steady state.
            out_ref[...] += d.reshape(tile_rows // 8, 8, LANES).sum(axis=0)
        else:
            # Tiny single-block case (rows < 8 or not a multiple of 8): one
            # sublane reduce, runs exactly once.
            out_ref[0:1, :] += jnp.sum(d, axis=0, keepdims=True)

    return kernel


def sndis_loss(pos: jax.Array, neg: jax.Array) -> jax.Array:
    """-mean(pos) + mean(neg), computed with a Pallas TPU streaming reduction."""
    assert pos.shape == neg.shape, "pos/neg must have the same shape"
    total = pos.size
    assert total > 0

    rows = pl.cdiv(total, LANES)
    if total % LANES == 0:
        # Pure reshape (no copy, no cast) -> lane-dense (rows, 128) view.
        pos2 = pos.reshape(rows, LANES)
        neg2 = neg.reshape(rows, LANES)
    else:
        # Rare ragged lane tail (< 128 elems): zero-pad (sum-neutral) so the
        # 2-D lane-dense view exists.  Only this uncommon case pays a pad pass.
        pad = rows * LANES - total
        pos2 = jnp.pad(pos.reshape(-1), (0, pad)).reshape(rows, LANES)
        neg2 = jnp.pad(neg.reshape(-1), (0, pad)).reshape(rows, LANES)

    tile_rows = rows if rows <= MAX_TILE_ROWS else MAX_TILE_ROWS
    total_blocks = pl.cdiv(rows, tile_rows)
    # Never spawn more shards than there are blocks of work -> no duplicate DMA
    # for small inputs.
    num_shards = min(MAX_SHARDS, total_blocks)
    blocks_per_shard = pl.cdiv(total_blocks, num_shards)
    need_mask = (num_shards * blocks_per_shard * tile_rows) != rows
    last_block = total_blocks - 1

    def in_index_map(s, i):
        b = s * blocks_per_shard + i
        # Clamp phantom blocks (uneven shard split) to a valid window; their
        # contribution is zeroed by the in-kernel row mask.
        return (jnp.minimum(b, last_block), 0)

    partials = pl.pallas_call(
        _make_kernel(rows, tile_rows, blocks_per_shard, need_mask),
        out_shape=jax.ShapeDtypeStruct((num_shards * 8, LANES), jnp.float32),
        grid_spec=pltpu.PrefetchScalarGridSpec(
            num_scalar_prefetch=0,
            grid=(num_shards, blocks_per_shard),
            in_specs=[
                pl.BlockSpec((tile_rows, LANES), in_index_map),
                pl.BlockSpec((tile_rows, LANES), in_index_map),
            ],
            out_specs=pl.BlockSpec((8, LANES), lambda s, i: (s, 0)),
        ),
        compiler_params=pltpu.CompilerParams(
            dimension_semantics=("parallel", "arbitrary"),
        ),
    )(pos2, neg2)

    # Tiny epilogue (<= 2 x (8,128) = 8 KiB): combine per-core partial slabs
    # and scale.  sum(neg - pos) / N == -mean(pos) + mean(neg).
    return jnp.sum(partials) * (1.0 / float(total))


if __name__ == "__main__":
    key = jax.random.PRNGKey(0)

    def check(k, shape):
        kp, kn = jax.random.split(k)
        pos = jax.random.normal(kp, shape, dtype=jnp.float32)
        neg = jax.random.normal(kn, shape, dtype=jnp.float32)
        loss = sndis_loss(pos, neg)
        jax.block_until_ready(loss)
        ref = -jnp.mean(pos) + jnp.mean(neg)
        assert jnp.allclose(loss, ref, atol=1e-5, rtol=1e-5), (shape, loss, ref)

    k1, k2, k3 = jax.random.split(key, 3)
    # Primary shape implied by the module (NCHW discriminator outputs).
    check(k1, (2, 4, 16, 16))      # 16 rows of 128 -> fold path, single block
    check(k2, (2, 16, 128, 128))   # 4096 rows -> streaming on both shards
    check(k3, (2, 3, 5, 7))        # 210 elems -> ragged lane tail + tiny-block path

    print("KERNEL_OK")
</pallas_src>

<mosaic_0001>
module attributes {stable_mosaic.version = 11 : i64} {
  func.func @kernel(%arg0: i32, %arg1: i32, %arg2: memref<16x128xf32, #tpu.memory_space<vmem>>, %arg3: memref<16x128xf32, #tpu.memory_space<vmem>>, %arg4: memref<8x128xf32, #tpu.memory_space<vmem>>) attributes {dimension_semantics = [#tpu.dimension_semantics<parallel>, #tpu.dimension_semantics<arbitrary>], iteration_bounds = array<i64: 1, 1>, scalar_prefetch = 0 : i64, scratch_operands = 0 : i64, tpu.core_type = #tpu.core_type<tc>, window_params = [{transform_indices = @transform_0, window_bounds = array<i64: 16, 128>}, {transform_indices = @transform_1, window_bounds = array<i64: 16, 128>}, {transform_indices = @transform_2, window_bounds = array<i64: 8, 128>}]} {
    %c0_i32 = arith.constant 0 : i32
    %0 = arith.cmpi eq, %arg1, %c0_i32 : i32
    %1 = arith.extui %0 : i1 to i32
    %c0_i32_0 = arith.constant 0 : i32
    %2 = arith.cmpi ne, %1, %c0_i32_0 : i32
    scf.if %2 {
      %cst_8 = arith.constant 0.000000e+00 : f32
      %11 = vector.broadcast %cst_8 : f32 to vector<8x128xf32>
      %c0_9 = arith.constant 0 : index
      %c0_10 = arith.constant 0 : index
      %12 = vector.load %arg4[%c0_9, %c0_10] : memref<8x128xf32, #tpu.memory_space<vmem>>, vector<8x128xf32>
      tpu.vector_store %arg4[%c0_9, %c0_10], %11 {strides = array<i32>} : memref<8x128xf32, #tpu.memory_space<vmem>>, vector<8x128xf32>,
    } else {
    }
    %c0 = arith.constant 0 : index
    %c0_1 = arith.constant 0 : index
    %3 = vector.load %arg3[%c0, %c0_1] : memref<16x128xf32, #tpu.memory_space<vmem>>, vector<16x128xf32>
    %c0_2 = arith.constant 0 : index
    %c0_3 = arith.constant 0 : index
    %4 = vector.load %arg2[%c0_2, %c0_3] : memref<16x128xf32, #tpu.memory_space<vmem>>, vector<16x128xf32>
    %5 = arith.subf %3, %4 : vector<16x128xf32>
    %c0_4 = arith.constant 0 : index
    %c0_5 = arith.constant 0 : index
    %6 = vector.load %arg4[%c0_4, %c0_5] : memref<8x128xf32, #tpu.memory_space<vmem>>, vector<8x128xf32>
    %7 = vector.shape_cast %5 : vector<16x128xf32> to vector<2x8x128xf32>
    %cst = arith.constant dense<0.000000e+00> : vector<8x128xf32>
    %8 = vector.multi_reduction <add>, %7, %cst [0] : vector<2x8x128xf32> to vector<8x128xf32>
    %9 = arith.addf %6, %8 : vector<8x128xf32>
    %c0_6 = arith.constant 0 : index
    %c0_7 = arith.constant 0 : index
    %10 = vector.load %arg4[%c0_6, %c0_7] : memref<8x128xf32, #tpu.memory_space<vmem>>, vector<8x128xf32>
    tpu.vector_store %arg4[%c0_6, %c0_7], %9 {strides = array<i32>} : memref<8x128xf32, #tpu.memory_space<vmem>>, vector<8x128xf32>,
    return
  }
  func.func @transform_0(%arg0: i32, %arg1: i32) -> (i32, i32) {
    %c1_i32 = arith.constant 1 : i32
    %0 = arith.muli %arg0, %c1_i32 : i32
    %1 = arith.addi %0, %arg1 : i32
    %c0_i32 = arith.constant 0 : i32
    %2 = arith.minsi %1, %c0_i32 : i32
    %c0_i32_0 = arith.constant 0 : i32
    %c0_i32_1 = arith.constant 0 : i32
    return %2, %c0_i32_0 : i32, i32
  }
  func.func @transform_1(%arg0: i32, %arg1: i32) -> (i32, i32) {
    %c1_i32 = arith.constant 1 : i32
    %0 = arith.muli %arg0, %c1_i32 : i32
    %1 = arith.addi %0, %arg1 : i32
    %c0_i32 = arith.constant 0 : i32
    %2 = arith.minsi %1, %c0_i32 : i32
    %c0_i32_0 = arith.constant 0 : i32
    %c0_i32_1 = arith.constant 0 : i32
    return %2, %c0_i32_0 : i32, i32
  }
  func.func @transform_2(%arg0: i32, %arg1: i32) -> (i32, i32) {
    %c0_i32 = arith.constant 0 : i32
    %c0_i32_0 = arith.constant 0 : i32
    return %arg0, %c0_i32 : i32, i32
  }
}

</mosaic_0001>

<bundles_post_ra>
// kernel: tpu_custom_call.1
= control target key start
LH: loop header
LB: loop body
LE: loop exit
PB: predicated region body
PF: predicated region fallthrough
CT: control target
= control target key end

     0   :  { %7 = vsyncpa [#allocation3], 0  ;;  %s229_s0 = inlined_call_operand.hbm [shape: f32[16,128], index: 0, kind: input, shape index: {}]   ;;  %s230_s1 = inlined_call_operand.hbm [shape: f32[16,128], index: 1, kind: input, shape index: {}]   ;;  %s231_s2 = inlined_call_operand.hbm [shape: f32[8,128], index: 2, kind: output, shape index: {}]  }
   0x1   :  { %8 = vsyncpa [#allocation6], 0 }
   0x2   :  { %9 = vsyncpa [#allocation4], 0  ;;  %s173_s9 = smov [#allocation2]   ;;  %s101_s13 = scalar_lea.hbm %s229_s0, 256 }
   0x3   :  { %s21_s10 = sshll.u32 %s173_s9, 4  ;;  %p102_p0 = scmp.ne.s32.totalorder %s229_s0, %s101_s13  ;;  %s22_s10 = int_to_ptr.vmem [resolvable:$true] %s21_s10 }
   0x4   :  { %p105_p1 = scmp.lt.u32.totalorder %s101_s13, %s229_s0 }
   0x6   :  { %p107_p2 = pnand %p105_p1, %p102_p0 }
   0x8   :  { %110 = shalt.err (!%p107_p2)
}
   0x9   :  { %s111_s18 = scalar_lea.vmem %s22_s10, 256  ;;  %p116_p4 = scmp.lt.s32.totalorder %s22_s10, %s22_s10 }
   0xa   :  { %p112_p3 = scmp.ne.s32.totalorder %s22_s10, %s111_s18  ;;  %p117_p5 = scmp.lt.s32.totalorder %s111_s18, %s111_s18 }
   0xc   :  { %p118_p6 = por %p117_p5, %p116_p4 }
   0xe   :  { %p119_p7 = pnand %p118_p6, %p112_p3 }
  0x10   :  { %122 = shalt.err (!%p119_p7)
}
  0x11   :  { %s174_s19 = smov 128   ;;  %s175_s20 = smov 8  }
  0x12   :  { %27 = dma.hbm_to_vmem [thread:$0]  %s229_s0, 256, %s22_s10, [#allocation3], %s174_s19, %s174_s19, %s175_s20  }
  0x13   :  { %s176_s23 = smov [#allocation5]   ;;  %s123_s27 = scalar_lea.hbm %s230_s1, 256 }
  0x14   :  { %s39_s24 = sshll.u32 %s176_s23, 4  ;;  %p124_p8 = scmp.ne.s32.totalorder %s230_s1, %s123_s27  ;;  %s40_s24 = int_to_ptr.vmem [resolvable:$true] %s39_s24 }
  0x15   :  { %p127_p9 = scmp.lt.u32.totalorder %s123_s27, %s230_s1 }
  0x17   :  { %p129_p10 = pnand %p127_p9, %p124_p8 }
  0x19   :  { %132 = shalt.err (!%p129_p10)
}
  0x1a   :  { %s133_s4 = scalar_lea.vmem %s40_s24, 256  ;;  %p138_p12 = scmp.lt.s32.totalorder %s40_s24, %s40_s24 }
  0x1b   :  { %p134_p11 = scmp.ne.s32.totalorder %s40_s24, %s133_s4  ;;  %p139_p13 = scmp.lt.s32.totalorder %s133_s4, %s133_s4 }
  0x1d   :  { %p140_p0 = por %p139_p13, %p138_p12 }
  0x1f   :  { %p141_p1 = pnand %p140_p0, %p134_p11 }
  0x21   :  { %144 = shalt.err (!%p141_p1)
}
  0x22   :  { %45 = dma.hbm_to_vmem [thread:$0]  %s230_s1, 256, %s40_s24, [#allocation6], %s174_s19, %s174_s19, %s175_s20  }
  0x23   :  { %167 = dma.done.wait [#allocation3], 256  }
  0x24   :  { %168 = vsyncadd [#allocation3], 4294967040 }
  0x25   :  { %169 = dma.done.wait [#allocation6], 256  }
  0x26   :  { %170 = vsyncadd [#allocation6], 4294967040  ;;  %v65_v0 = vld [vmem:[#allocation5] sm:$0xff]  ;;  %v66_v1 = vld [vmem:[#allocation5 + $0x8] sm:$0xff]  ;;  %s177_s6 = smov [#allocation7]  }
  0x27   :  { %v67_v2 = vld [vmem:[#allocation2] sm:$0xff]  ;;  %v68_v3 = vld [vmem:[#allocation2 + $0x8] sm:$0xff]  ;;  %s81_s7 = sshll.u32 %s177_s6, 4  ;;  %s82_s7 = int_to_ptr.vmem [resolvable:$true] %s81_s7 }
  0x28   :  { %v69_v4 = vsub.f32 %v65_v0, %v67_v2  ;;  %v70_v5 = vsub.f32 %v66_v1, %v68_v3  ;;  %s145_s8 = scalar_lea.vmem %s82_s7, 128  ;;  %p150_p3 = scmp.lt.s32.totalorder %s82_s7, %s82_s7 }
  0x29   :  { %p146_p2 = scmp.ne.s32.totalorder %s82_s7, %s145_s8  ;;  %p151_p4 = scmp.lt.s32.totalorder %s145_s8, %s145_s8 }
  0x2a   :  { %v72_v6 = vadd.f32 %v70_v5, %v69_v4 }
  0x2b   :  { %p152_p5 = por %p151_p4, %p150_p3 }
  0x2c   :  { %74 = vst [vmem:[#allocation7] sm:$0xff] %v72_v6 }
  0x2d   :  { %p153_p6 = pnand %p152_p5, %p146_p2 }
  0x2f   :  { %156 = shalt.err (!%p153_p6)
}
  0x30   :  { %s157_s10 = scalar_lea.hbm %s231_s2, 128 }
  0x31   :  { %p158_p7 = scmp.ne.s32.totalorder %s231_s2, %s157_s10  ;;  %p161_p8 = scmp.lt.u32.totalorder %s157_s10, %s231_s2 }
  0x33   :  { %p163_p9 = pnand %p161_p8, %p158_p7 }
  0x35   :  { %166 = shalt.err (!%p163_p9)
}
  0x36   :  { %84 = dma.vmem_to_hbm [thread:$0]  %s82_s7, 128, %s231_s2, [#allocation4]  }
  0x37   :  { %171 = dma.done.wait [#allocation4], 128  }
  0x38   :  { %172 = vsyncadd [#allocation4], 4294967168 }
  0x39   :  { %88 = vsyncpa [#allocation3], 1 }
  0x3a   :  { %89 = vsyncpa [#allocation6], 1 }
  0x3b   :  { %90 = vsyncpa [#allocation4], 1 }

</bundles_post_ra>
